<compile_context>
chip_gen: v7x
topology: tpu7x:2x2x1
jax: 0.10.0
libtpu: 0.0.40
codegen_flags: <defaults>
</compile_context>

<pallas_src>
import jax
import jax.numpy as jnp
from jax import lax
from jax.experimental import pallas as pl
from jax.experimental.pallas import tpu as pltpu

# ---------------- synthetic config (CFG_DICT['DATASET'] stand-in) ----------------
NUM_USERS = 128
NUM_SEX = 2
NUM_AGES = 7
NUM_OCCUPS = 21
NUM_ZIPS = 100
EMB_SIZE = 32
BATCH = 8


# ---------------- Pallas kernel: fused in-VMEM gather + concat ----------------
def _user_rep_kernel(idx_ref,    # SMEM [B_pad, 5] int32 (scalar prefetch)
                     user_ref,   # VMEM [NUM_USERS, 5E]   resident user table
                     small_ref,  # VMEM [V_small,  E]     fused gender/age/occup/zip
                     out_ref):   # VMEM [TB, 9E]          output block (this batch tile)
    e = small_ref.shape[1]
    tb = out_ref.shape[0]
    base = pl.program_id(0) * tb

    def gather_row(r, carry):
        row = base + r
        uid = idx_ref[row, 0]
        # user segment: lanes [0, 5E)
        out_ref[pl.ds(r, 1), 0:5 * e] = user_ref[pl.ds(uid, 1), :]
        # gender / age / occup / zip segments: lanes [5E+j*E, 5E+(j+1)*E)
        for j in range(4):
            sidx = idx_ref[row, 1 + j]
            out_ref[pl.ds(r, 1), (5 + j) * e:(6 + j) * e] = small_ref[pl.ds(sidx, 1), :]
        return carry

    # Short tiles: unroll for LLO scheduler visibility; long tiles: rolled loop.
    lax.fori_loop(0, tb, gather_row, None, unroll=(tb <= 32))


def user_rep_forward(params, data, *, tile_rows=256):
    """data: [B, 1, >=5] with cols 0..4 = (user, sex, age, occupation, zip) indices."""
    e = params["gender_emb"].shape[-1]
    n_user = params["user_emb"].shape[0]
    small_vocab = [params["gender_emb"].shape[0], params["age_emb"].shape[0],
                   params["occup_emb"].shape[0], params["zip_emb"].shape[0]]

    raw = data[:, 0, 0:5].astype(jnp.int32)               # [B, 5]  (like .to(long))
    batch = raw.shape[0]

    # Clamp indices (robustness) and fold the 4 small indices onto the fused table.
    uid = jnp.clip(raw[:, 0], 0, n_user - 1)
    cols, off = [uid], 0
    for j, v in enumerate(small_vocab):
        cols.append(jnp.clip(raw[:, 1 + j], 0, v - 1) + off)
        off += v
    idx = jnp.stack(cols, axis=1).astype(jnp.int32)        # [B, 5]

    user_tab = params["user_emb"]                          # [NUM_USERS, 5E]
    small_tab = jnp.concatenate([params["gender_emb"], params["age_emb"],
                                 params["occup_emb"], params["zip_emb"]], axis=0)

    # Batch tile: multiple of 8 sublanes, up to `tile_rows` rows per grid step.
    tb = min(tile_rows, ((batch + 7) // 8) * 8)
    b_pad = ((batch + tb - 1) // tb) * tb
    if b_pad != batch:
        idx = jnp.pad(idx, ((0, b_pad - batch), (0, 0)))   # index 0 is always valid

    grid_spec = pltpu.PrefetchScalarGridSpec(
        num_scalar_prefetch=1,                             # idx -> SMEM
        grid=(b_pad // tb,),
        in_specs=[
            # Whole table per block, block index always (0,0) -> VMEM-resident,
            # DMA'd once across the whole grid.
            pl.BlockSpec(user_tab.shape, lambda i, idx_ref: (0, 0)),
            pl.BlockSpec(small_tab.shape, lambda i, idx_ref: (0, 0)),
        ],
        out_specs=pl.BlockSpec((tb, 9 * e), lambda i, idx_ref: (i, 0)),
    )

    out = pl.pallas_call(
        _user_rep_kernel,
        out_shape=jax.ShapeDtypeStruct((b_pad, 9 * e), jnp.float32),
        grid_spec=grid_spec,
        compiler_params=pltpu.CompilerParams(
            # Batch tiles are independent.  NOTE(review): on v7x a real 2-TC
            # split may need CORE_PARALLEL / core_map; "parallel" is harmless
            # on single-TC v5e/v6e and at small grids.
            dimension_semantics=("parallel",),
            # Explicit, conservative scoped-VMEM limit (fits v5e/v6e/v7x).
            vmem_limit_bytes=32 * 1024 * 1024,
        ),
    )(idx, user_tab, small_tab)

    return out[:batch]                                     # [B, 9E]


# ---------------- deterministic parameter init ----------------
def init_params(key, emb_size):
    ks = jax.random.split(key, 5)
    scale = 0.05

    def w(k, shape):
        return (scale * jax.random.normal(k, shape)).astype(jnp.float32)

    user = w(ks[0], (NUM_USERS, 5 * emb_size))
    user = user.at[0].set(0.0)   # nn.Embedding(padding_idx=0): row 0 zero-initialized
    return {
        "user_emb":   user,
        "gender_emb": w(ks[1], (NUM_SEX, emb_size)),
        "age_emb":    w(ks[2], (NUM_AGES, emb_size)),
        "occup_emb":  w(ks[3], (NUM_OCCUPS, emb_size)),
        "zip_emb":    w(ks[4], (NUM_ZIPS, emb_size)),
    }


if __name__ == "__main__":
    key = jax.random.PRNGKey(0)
    pkey, dkey = jax.random.split(key)

    params = init_params(pkey, EMB_SIZE)

    # data: [B, 1, 5]  (user, sex, age, occupation, zip) — float input, cast like .to(long)
    uid = jax.random.randint(dkey, (BATCH,), 0, NUM_USERS)
    sex = jax.random.randint(jax.random.fold_in(dkey, 1), (BATCH,), 0, NUM_SEX)
    age = jax.random.randint(jax.random.fold_in(dkey, 2), (BATCH,), 0, NUM_AGES)
    occ = jax.random.randint(jax.random.fold_in(dkey, 3), (BATCH,), 0, NUM_OCCUPS)
    zp  = jax.random.randint(jax.random.fold_in(dkey, 4), (BATCH,), 0, NUM_ZIPS)
    data = jnp.stack([uid, sex, age, occ, zp], axis=1)[:, None, :].astype(jnp.float32)

    fwd = jax.jit(user_rep_forward)
    out = jax.block_until_ready(fwd(params, data))

    # pure-JAX reference of the PyTorch forward
    ref = jnp.concatenate(
        [params["user_emb"][uid],
         params["gender_emb"][sex],
         params["age_emb"][age],
         params["occup_emb"][occ],
         params["zip_emb"][zp]], axis=1)

    assert out.shape == (BATCH, 9 * EMB_SIZE)
    assert bool(jnp.all(jnp.isfinite(out)))
    assert bool(jnp.allclose(out, ref, rtol=0.0, atol=0.0))
    print("KERNEL_OK")
</pallas_src>

<mosaic_0001>
module attributes {stable_mosaic.version = 11 : i64} {
  func.func @_user_rep_kernel(%arg0: i32, %arg1: memref<8x5xi32, #tpu.memory_space<smem>>, %arg2: memref<128x160xf32, #tpu.memory_space<vmem>>, %arg3: memref<130x32xf32, #tpu.memory_space<vmem>>, %arg4: memref<8x288xf32, #tpu.memory_space<vmem>>) attributes {dimension_semantics = [#tpu.dimension_semantics<parallel>], iteration_bounds = array<i64: 1>, scalar_prefetch = 1 : i64, scratch_operands = 0 : i64, tpu.core_type = #tpu.core_type<tc>, window_params = [{pipeline_mode = #tpu.pipeline_mode<synchronous>, transform_indices = @transform_0, window_bounds = array<i64: 128, 160>}, {pipeline_mode = #tpu.pipeline_mode<synchronous>, transform_indices = @transform_1, window_bounds = array<i64: 130, 32>}, {transform_indices = @transform_2, window_bounds = array<i64: 8, 288>}]} {
    %c8_i32 = arith.constant 8 : i32
    %0 = arith.muli %arg0, %c8_i32 : i32
    %c0_i32 = arith.constant 0 : i32
    %1 = arith.addi %0, %c0_i32 : i32
    %2 = arith.index_cast %1 : i32 to index
    %c0 = arith.constant 0 : index
    %3 = memref.load %arg1[%2, %c0] : memref<8x5xi32, #tpu.memory_space<smem>>
    %4 = arith.index_cast %3 : i32 to index
    %c0_0 = arith.constant 0 : index
    %5 = vector.load %arg2[%4, %c0_0] : memref<128x160xf32, #tpu.memory_space<vmem>>, vector<1x160xf32>
    %6 = arith.index_cast %c0_i32 : i32 to index
    %c0_1 = arith.constant 0 : index
    %7 = vector.load %arg4[%6, %c0_1] : memref<8x288xf32, #tpu.memory_space<vmem>>, vector<1x160xf32>
    tpu.vector_store %arg4[%6, %c0_1], %5 {strides = array<i32>} : memref<8x288xf32, #tpu.memory_space<vmem>>, vector<1x160xf32>,
    %8 = arith.index_cast %1 : i32 to index
    %c1 = arith.constant 1 : index
    %9 = memref.load %arg1[%8, %c1] : memref<8x5xi32, #tpu.memory_space<smem>>
    %10 = arith.index_cast %9 : i32 to index
    %c0_2 = arith.constant 0 : index
    %11 = vector.load %arg3[%10, %c0_2] : memref<130x32xf32, #tpu.memory_space<vmem>>, vector<1x32xf32>
    %12 = arith.index_cast %c0_i32 : i32 to index
    %c160 = arith.constant 160 : index
    %13 = vector.load %arg4[%12, %c160] : memref<8x288xf32, #tpu.memory_space<vmem>>, vector<1x32xf32>
    tpu.vector_store %arg4[%12, %c160], %11 {strides = array<i32>} : memref<8x288xf32, #tpu.memory_space<vmem>>, vector<1x32xf32>,
    %14 = arith.index_cast %1 : i32 to index
    %c2 = arith.constant 2 : index
    %15 = memref.load %arg1[%14, %c2] : memref<8x5xi32, #tpu.memory_space<smem>>
    %16 = arith.index_cast %15 : i32 to index
    %c0_3 = arith.constant 0 : index
    %17 = vector.load %arg3[%16, %c0_3] : memref<130x32xf32, #tpu.memory_space<vmem>>, vector<1x32xf32>
    %18 = arith.index_cast %c0_i32 : i32 to index
    %c192 = arith.constant 192 : index
    %19 = vector.load %arg4[%18, %c192] : memref<8x288xf32, #tpu.memory_space<vmem>>, vector<1x32xf32>
    tpu.vector_store %arg4[%18, %c192], %17 {strides = array<i32>} : memref<8x288xf32, #tpu.memory_space<vmem>>, vector<1x32xf32>,
    %20 = arith.index_cast %1 : i32 to index
    %c3 = arith.constant 3 : index
    %21 = memref.load %arg1[%20, %c3] : memref<8x5xi32, #tpu.memory_space<smem>>
    %22 = arith.index_cast %21 : i32 to index
    %c0_4 = arith.constant 0 : index
    %23 = vector.load %arg3[%22, %c0_4] : memref<130x32xf32, #tpu.memory_space<vmem>>, vector<1x32xf32>
    %24 = arith.index_cast %c0_i32 : i32 to index
    %c224 = arith.constant 224 : index
    %25 = vector.load %arg4[%24, %c224] : memref<8x288xf32, #tpu.memory_space<vmem>>, vector<1x32xf32>
    tpu.vector_store %arg4[%24, %c224], %23 {strides = array<i32>} : memref<8x288xf32, #tpu.memory_space<vmem>>, vector<1x32xf32>,
    %26 = arith.index_cast %1 : i32 to index
    %c4 = arith.constant 4 : index
    %27 = memref.load %arg1[%26, %c4] : memref<8x5xi32, #tpu.memory_space<smem>>
    %28 = arith.index_cast %27 : i32 to index
    %c0_5 = arith.constant 0 : index
    %29 = vector.load %arg3[%28, %c0_5] : memref<130x32xf32, #tpu.memory_space<vmem>>, vector<1x32xf32>
    %30 = arith.index_cast %c0_i32 : i32 to index
    %c256 = arith.constant 256 : index
    %31 = vector.load %arg4[%30, %c256] : memref<8x288xf32, #tpu.memory_space<vmem>>, vector<1x32xf32>
    tpu.vector_store %arg4[%30, %c256], %29 {strides = array<i32>} : memref<8x288xf32, #tpu.memory_space<vmem>>, vector<1x32xf32>,
    %c1_i32 = arith.constant 1 : i32
    %32 = arith.addi %0, %c1_i32 : i32
    %33 = arith.index_cast %32 : i32 to index
    %c0_6 = arith.constant 0 : index
    %34 = memref.load %arg1[%33, %c0_6] : memref<8x5xi32, #tpu.memory_space<smem>>
    %35 = arith.index_cast %34 : i32 to index
    %c0_7 = arith.constant 0 : index
    %36 = vector.load %arg2[%35, %c0_7] : memref<128x160xf32, #tpu.memory_space<vmem>>, vector<1x160xf32>
    %37 = arith.index_cast %c1_i32 : i32 to index
    %c0_8 = arith.constant 0 : index
    %38 = vector.load %arg4[%37, %c0_8] : memref<8x288xf32, #tpu.memory_space<vmem>>, vector<1x160xf32>
    tpu.vector_store %arg4[%37, %c0_8], %36 {strides = array<i32>} : memref<8x288xf32, #tpu.memory_space<vmem>>, vector<1x160xf32>,
    %39 = arith.index_cast %32 : i32 to index
    %c1_9 = arith.constant 1 : index
    %40 = memref.load %arg1[%39, %c1_9] : memref<8x5xi32, #tpu.memory_space<smem>>
    %41 = arith.index_cast %40 : i32 to index
    %c0_10 = arith.constant 0 : index
    %42 = vector.load %arg3[%41, %c0_10] : memref<130x32xf32, #tpu.memory_space<vmem>>, vector<1x32xf32>
    %43 = arith.index_cast %c1_i32 : i32 to index
    %c160_11 = arith.constant 160 : index
    %44 = vector.load %arg4[%43, %c160_11] : memref<8x288xf32, #tpu.memory_space<vmem>>, vector<1x32xf32>
    tpu.vector_store %arg4[%43, %c160_11], %42 {strides = array<i32>} : memref<8x288xf32, #tpu.memory_space<vmem>>, vector<1x32xf32>,
    %45 = arith.index_cast %32 : i32 to index
    %c2_12 = arith.constant 2 : index
    %46 = memref.load %arg1[%45, %c2_12] : memref<8x5xi32, #tpu.memory_space<smem>>
    %47 = arith.index_cast %46 : i32 to index
    %c0_13 = arith.constant 0 : index
    %48 = vector.load %arg3[%47, %c0_13] : memref<130x32xf32, #tpu.memory_space<vmem>>, vector<1x32xf32>
    %49 = arith.index_cast %c1_i32 : i32 to index
    %c192_14 = arith.constant 192 : index
    %50 = vector.load %arg4[%49, %c192_14] : memref<8x288xf32, #tpu.memory_space<vmem>>, vector<1x32xf32>
    tpu.vector_store %arg4[%49, %c192_14], %48 {strides = array<i32>} : memref<8x288xf32, #tpu.memory_space<vmem>>, vector<1x32xf32>,
    %51 = arith.index_cast %32 : i32 to index
    %c3_15 = arith.constant 3 : index
    %52 = memref.load %arg1[%51, %c3_15] : memref<8x5xi32, #tpu.memory_space<smem>>
    %53 = arith.index_cast %52 : i32 to index
    %c0_16 = arith.constant 0 : index
    %54 = vector.load %arg3[%53, %c0_16] : memref<130x32xf32, #tpu.memory_space<vmem>>, vector<1x32xf32>
    %55 = arith.index_cast %c1_i32 : i32 to index
    %c224_17 = arith.constant 224 : index
    %56 = vector.load %arg4[%55, %c224_17] : memref<8x288xf32, #tpu.memory_space<vmem>>, vector<1x32xf32>
    tpu.vector_store %arg4[%55, %c224_17], %54 {strides = array<i32>} : memref<8x288xf32, #tpu.memory_space<vmem>>, vector<1x32xf32>,
    %57 = arith.index_cast %32 : i32 to index
    %c4_18 = arith.constant 4 : index
    %58 = memref.load %arg1[%57, %c4_18] : memref<8x5xi32, #tpu.memory_space<smem>>
    %59 = arith.index_cast %58 : i32 to index
    %c0_19 = arith.constant 0 : index
    %60 = vector.load %arg3[%59, %c0_19] : memref<130x32xf32, #tpu.memory_space<vmem>>, vector<1x32xf32>
    %61 = arith.index_cast %c1_i32 : i32 to index
    %c256_20 = arith.constant 256 : index
    %62 = vector.load %arg4[%61, %c256_20] : memref<8x288xf32, #tpu.memory_space<vmem>>, vector<1x32xf32>
    tpu.vector_store %arg4[%61, %c256_20], %60 {strides = array<i32>} : memref<8x288xf32, #tpu.memory_space<vmem>>, vector<1x32xf32>,
    %c2_i32 = arith.constant 2 : i32
    %63 = arith.addi %0, %c2_i32 : i32
    %64 = arith.index_cast %63 : i32 to index
    %c0_21 = arith.constant 0 : index
    %65 = memref.load %arg1[%64, %c0_21] : memref<8x5xi32, #tpu.memory_space<smem>>
    %66 = arith.index_cast %65 : i32 to index
    %c0_22 = arith.constant 0 : index
    %67 = vector.load %arg2[%66, %c0_22] : memref<128x160xf32, #tpu.memory_space<vmem>>, vector<1x160xf32>
    %68 = arith.index_cast %c2_i32 : i32 to index
    %c0_23 = arith.constant 0 : index
    %69 = vector.load %arg4[%68, %c0_23] : memref<8x288xf32, #tpu.memory_space<vmem>>, vector<1x160xf32>
    tpu.vector_store %arg4[%68, %c0_23], %67 {strides = array<i32>} : memref<8x288xf32, #tpu.memory_space<vmem>>, vector<1x160xf32>,
    %70 = arith.index_cast %63 : i32 to index
    %c1_24 = arith.constant 1 : index
    %71 = memref.load %arg1[%70, %c1_24] : memref<8x5xi32, #tpu.memory_space<smem>>
    %72 = arith.index_cast %71 : i32 to index
    %c0_25 = arith.constant 0 : index
    %73 = vector.load %arg3[%72, %c0_25] : memref<130x32xf32, #tpu.memory_space<vmem>>, vector<1x32xf32>
    %74 = arith.index_cast %c2_i32 : i32 to index
    %c160_26 = arith.constant 160 : index
    %75 = vector.load %arg4[%74, %c160_26] : memref<8x288xf32, #tpu.memory_space<vmem>>, vector<1x32xf32>
    tpu.vector_store %arg4[%74, %c160_26], %73 {strides = array<i32>} : memref<8x288xf32, #tpu.memory_space<vmem>>, vector<1x32xf32>,
    %76 = arith.index_cast %63 : i32 to index
    %c2_27 = arith.constant 2 : index
    %77 = memref.load %arg1[%76, %c2_27] : memref<8x5xi32, #tpu.memory_space<smem>>
    %78 = arith.index_cast %77 : i32 to index
    %c0_28 = arith.constant 0 : index
    %79 = vector.load %arg3[%78, %c0_28] : memref<130x32xf32, #tpu.memory_space<vmem>>, vector<1x32xf32>
    %80 = arith.index_cast %c2_i32 : i32 to index
    %c192_29 = arith.constant 192 : index
    %81 = vector.load %arg4[%80, %c192_29] : memref<8x288xf32, #tpu.memory_space<vmem>>, vector<1x32xf32>
    tpu.vector_store %arg4[%80, %c192_29], %79 {strides = array<i32>} : memref<8x288xf32, #tpu.memory_space<vmem>>, vector<1x32xf32>,
    %82 = arith.index_cast %63 : i32 to index
    %c3_30 = arith.constant 3 : index
    %83 = memref.load %arg1[%82, %c3_30] : memref<8x5xi32, #tpu.memory_space<smem>>
    %84 = arith.index_cast %83 : i32 to index
    %c0_31 = arith.constant 0 : index
    %85 = vector.load %arg3[%84, %c0_31] : memref<130x32xf32, #tpu.memory_space<vmem>>, vector<1x32xf32>
    %86 = arith.index_cast %c2_i32 : i32 to index
    %c224_32 = arith.constant 224 : index
    %87 = vector.load %arg4[%86, %c224_32] : memref<8x288xf32, #tpu.memory_space<vmem>>, vector<1x32xf32>
    tpu.vector_store %arg4[%86, %c224_32], %85 {strides = array<i32>} : memref<8x288xf32, #tpu.memory_space<vmem>>, vector<1x32xf32>,
    %88 = arith.index_cast %63 : i32 to index
    %c4_33 = arith.constant 4 : index
    %89 = memref.load %arg1[%88, %c4_33] : memref<8x5xi32, #tpu.memory_space<smem>>
    %90 = arith.index_cast %89 : i32 to index
    %c0_34 = arith.constant 0 : index
    %91 = vector.load %arg3[%90, %c0_34] : memref<130x32xf32, #tpu.memory_space<vmem>>, vector<1x32xf32>
    %92 = arith.index_cast %c2_i32 : i32 to index
    %c256_35 = arith.constant 256 : index
    %93 = vector.load %arg4[%92, %c256_35] : memref<8x288xf32, #tpu.memory_space<vmem>>, vector<1x32xf32>
    tpu.vector_store %arg4[%92, %c256_35], %91 {strides = array<i32>} : memref<8x288xf32, #tpu.memory_space<vmem>>, vector<1x32xf32>,
    %c3_i32 = arith.constant 3 : i32
    %94 = arith.addi %0, %c3_i32 : i32
    %95 = arith.index_cast %94 : i32 to index
    %c0_36 = arith.constant 0 : index
    %96 = memref.load %arg1[%95, %c0_36] : memref<8x5xi32, #tpu.memory_space<smem>>
    %97 = arith.index_cast %96 : i32 to index
    %c0_37 = arith.constant 0 : index
    %98 = vector.load %arg2[%97, %c0_37] : memref<128x160xf32, #tpu.memory_space<vmem>>, vector<1x160xf32>
    %99 = arith.index_cast %c3_i32 : i32 to index
    %c0_38 = arith.constant 0 : index
    %100 = vector.load %arg4[%99, %c0_38] : memref<8x288xf32, #tpu.memory_space<vmem>>, vector<1x160xf32>
    tpu.vector_store %arg4[%99, %c0_38], %98 {strides = array<i32>} : memref<8x288xf32, #tpu.memory_space<vmem>>, vector<1x160xf32>,
    %101 = arith.index_cast %94 : i32 to index
    %c1_39 = arith.constant 1 : index
    %102 = memref.load %arg1[%101, %c1_39] : memref<8x5xi32, #tpu.memory_space<smem>>
    %103 = arith.index_cast %102 : i32 to index
    %c0_40 = arith.constant 0 : index
    %104 = vector.load %arg3[%103, %c0_40] : memref<130x32xf32, #tpu.memory_space<vmem>>, vector<1x32xf32>
    %105 = arith.index_cast %c3_i32 : i32 to index
    %c160_41 = arith.constant 160 : index
    %106 = vector.load %arg4[%105, %c160_41] : memref<8x288xf32, #tpu.memory_space<vmem>>, vector<1x32xf32>
    tpu.vector_store %arg4[%105, %c160_41], %104 {strides = array<i32>} : memref<8x288xf32, #tpu.memory_space<vmem>>, vector<1x32xf32>,
    %107 = arith.index_cast %94 : i32 to index
    %c2_42 = arith.constant 2 : index
    %108 = memref.load %arg1[%107, %c2_42] : memref<8x5xi32, #tpu.memory_space<smem>>
    %109 = arith.index_cast %108 : i32 to index
    %c0_43 = arith.constant 0 : index
    %110 = vector.load %arg3[%109, %c0_43] : memref<130x32xf32, #tpu.memory_space<vmem>>, vector<1x32xf32>
    %111 = arith.index_cast %c3_i32 : i32 to index
    %c192_44 = arith.constant 192 : index
    %112 = vector.load %arg4[%111, %c192_44] : memref<8x288xf32, #tpu.memory_space<vmem>>, vector<1x32xf32>
    tpu.vector_store %arg4[%111, %c192_44], %110 {strides = array<i32>} : memref<8x288xf32, #tpu.memory_space<vmem>>, vector<1x32xf32>,
    %113 = arith.index_cast %94 : i32 to index
    %c3_45 = arith.constant 3 : index
    %114 = memref.load %arg1[%113, %c3_45] : memref<8x5xi32, #tpu.memory_space<smem>>
    %115 = arith.index_cast %114 : i32 to index
    %c0_46 = arith.constant 0 : index
    %116 = vector.load %arg3[%115, %c0_46] : memref<130x32xf32, #tpu.memory_space<vmem>>, vector<1x32xf32>
    %117 = arith.index_cast %c3_i32 : i32 to index
    %c224_47 = arith.constant 224 : index
    %118 = vector.load %arg4[%117, %c224_47] : memref<8x288xf32, #tpu.memory_space<vmem>>, vector<1x32xf32>
    tpu.vector_store %arg4[%117, %c224_47], %116 {strides = array<i32>} : memref<8x288xf32, #tpu.memory_space<vmem>>, vector<1x32xf32>,
    %119 = arith.index_cast %94 : i32 to index
    %c4_48 = arith.constant 4 : index
    %120 = memref.load %arg1[%119, %c4_48] : memref<8x5xi32, #tpu.memory_space<smem>>
    %121 = arith.index_cast %120 : i32 to index
    %c0_49 = arith.constant 0 : index
    %122 = vector.load %arg3[%121, %c0_49] : memref<130x32xf32, #tpu.memory_space<vmem>>, vector<1x32xf32>
    %123 = arith.index_cast %c3_i32 : i32 to index
    %c256_50 = arith.constant 256 : index
    %124 = vector.load %arg4[%123, %c256_50] : memref<8x288xf32, #tpu.memory_space<vmem>>, vector<1x32xf32>
    tpu.vector_store %arg4[%123, %c256_50], %122 {strides = array<i32>} : memref<8x288xf32, #tpu.memory_space<vmem>>, vector<1x32xf32>,
    %c4_i32 = arith.constant 4 : i32
    %125 = arith.addi %0, %c4_i32 : i32
    %126 = arith.index_cast %125 : i32 to index
    %c0_51 = arith.constant 0 : index
    %127 = memref.load %arg1[%126, %c0_51] : memref<8x5xi32, #tpu.memory_space<smem>>
    %128 = arith.index_cast %127 : i32 to index
    %c0_52 = arith.constant 0 : index
    %129 = vector.load %arg2[%128, %c0_52] : memref<128x160xf32, #tpu.memory_space<vmem>>, vector<1x160xf32>
    %130 = arith.index_cast %c4_i32 : i32 to index
    %c0_53 = arith.constant 0 : index
    %131 = vector.load %arg4[%130, %c0_53] : memref<8x288xf32, #tpu.memory_space<vmem>>, vector<1x160xf32>
    tpu.vector_store %arg4[%130, %c0_53], %129 {strides = array<i32>} : memref<8x288xf32, #tpu.memory_space<vmem>>, vector<1x160xf32>,
    %132 = arith.index_cast %125 : i32 to index
    %c1_54 = arith.constant 1 : index
    %133 = memref.load %arg1[%132, %c1_54] : memref<8x5xi32, #tpu.memory_space<smem>>
    %134 = arith.index_cast %133 : i32 to index
    %c0_55 = arith.constant 0 : index
    %135 = vector.load %arg3[%134, %c0_55] : memref<130x32xf32, #tpu.memory_space<vmem>>, vector<1x32xf32>
    %136 = arith.index_cast %c4_i32 : i32 to index
    %c160_56 = arith.constant 160 : index
    %137 = vector.load %arg4[%136, %c160_56] : memref<8x288xf32, #tpu.memory_space<vmem>>, vector<1x32xf32>
    tpu.vector_store %arg4[%136, %c160_56], %135 {strides = array<i32>} : memref<8x288xf32, #tpu.memory_space<vmem>>, vector<1x32xf32>,
    %138 = arith.index_cast %125 : i32 to index
    %c2_57 = arith.constant 2 : index
    %139 = memref.load %arg1[%138, %c2_57] : memref<8x5xi32, #tpu.memory_space<smem>>
    %140 = arith.index_cast %139 : i32 to index
    %c0_58 = arith.constant 0 : index
    %141 = vector.load %arg3[%140, %c0_58] : memref<130x32xf32, #tpu.memory_space<vmem>>, vector<1x32xf32>
    %142 = arith.index_cast %c4_i32 : i32 to index
    %c192_59 = arith.constant 192 : index
    %143 = vector.load %arg4[%142, %c192_59] : memref<8x288xf32, #tpu.memory_space<vmem>>, vector<1x32xf32>
    tpu.vector_store %arg4[%142, %c192_59], %141 {strides = array<i32>} : memref<8x288xf32, #tpu.memory_space<vmem>>, vector<1x32xf32>,
    %144 = arith.index_cast %125 : i32 to index
    %c3_60 = arith.constant 3 : index
    %145 = memref.load %arg1[%144, %c3_60] : memref<8x5xi32, #tpu.memory_space<smem>>
    %146 = arith.index_cast %145 : i32 to index
    %c0_61 = arith.constant 0 : index
    %147 = vector.load %arg3[%146, %c0_61] : memref<130x32xf32, #tpu.memory_space<vmem>>, vector<1x32xf32>
    %148 = arith.index_cast %c4_i32 : i32 to index
    %c224_62 = arith.constant 224 : index
    %149 = vector.load %arg4[%148, %c224_62] : memref<8x288xf32, #tpu.memory_space<vmem>>, vector<1x32xf32>
    tpu.vector_store %arg4[%148, %c224_62], %147 {strides = array<i32>} : memref<8x288xf32, #tpu.memory_space<vmem>>, vector<1x32xf32>,
    %150 = arith.index_cast %125 : i32 to index
    %c4_63 = arith.constant 4 : index
    %151 = memref.load %arg1[%150, %c4_63] : memref<8x5xi32, #tpu.memory_space<smem>>
    %152 = arith.index_cast %151 : i32 to index
    %c0_64 = arith.constant 0 : index
    %153 = vector.load %arg3[%152, %c0_64] : memref<130x32xf32, #tpu.memory_space<vmem>>, vector<1x32xf32>
    %154 = arith.index_cast %c4_i32 : i32 to index
    %c256_65 = arith.constant 256 : index
    %155 = vector.load %arg4[%154, %c256_65] : memref<8x288xf32, #tpu.memory_space<vmem>>, vector<1x32xf32>
    tpu.vector_store %arg4[%154, %c256_65], %153 {strides = array<i32>} : memref<8x288xf32, #tpu.memory_space<vmem>>, vector<1x32xf32>,
    %c5_i32 = arith.constant 5 : i32
    %156 = arith.addi %0, %c5_i32 : i32
    %157 = arith.index_cast %156 : i32 to index
    %c0_66 = arith.constant 0 : index
    %158 = memref.load %arg1[%157, %c0_66] : memref<8x5xi32, #tpu.memory_space<smem>>
    %159 = arith.index_cast %158 : i32 to index
    %c0_67 = arith.constant 0 : index
    %160 = vector.load %arg2[%159, %c0_67] : memref<128x160xf32, #tpu.memory_space<vmem>>, vector<1x160xf32>
    %161 = arith.index_cast %c5_i32 : i32 to index
    %c0_68 = arith.constant 0 : index
    %162 = vector.load %arg4[%161, %c0_68] : memref<8x288xf32, #tpu.memory_space<vmem>>, vector<1x160xf32>
    tpu.vector_store %arg4[%161, %c0_68], %160 {strides = array<i32>} : memref<8x288xf32, #tpu.memory_space<vmem>>, vector<1x160xf32>,
    %163 = arith.index_cast %156 : i32 to index
    %c1_69 = arith.constant 1 : index
    %164 = memref.load %arg1[%163, %c1_69] : memref<8x5xi32, #tpu.memory_space<smem>>
    %165 = arith.index_cast %164 : i32 to index
    %c0_70 = arith.constant 0 : index
    %166 = vector.load %arg3[%165, %c0_70] : memref<130x32xf32, #tpu.memory_space<vmem>>, vector<1x32xf32>
    %167 = arith.index_cast %c5_i32 : i32 to index
    %c160_71 = arith.constant 160 : index
    %168 = vector.load %arg4[%167, %c160_71] : memref<8x288xf32, #tpu.memory_space<vmem>>, vector<1x32xf32>
    tpu.vector_store %arg4[%167, %c160_71], %166 {strides = array<i32>} : memref<8x288xf32, #tpu.memory_space<vmem>>, vector<1x32xf32>,
    %169 = arith.index_cast %156 : i32 to index
    %c2_72 = arith.constant 2 : index
    %170 = memref.load %arg1[%169, %c2_72] : memref<8x5xi32, #tpu.memory_space<smem>>
    %171 = arith.index_cast %170 : i32 to index
    %c0_73 = arith.constant 0 : index
    %172 = vector.load %arg3[%171, %c0_73] : memref<130x32xf32, #tpu.memory_space<vmem>>, vector<1x32xf32>
    %173 = arith.index_cast %c5_i32 : i32 to index
    %c192_74 = arith.constant 192 : index
    %174 = vector.load %arg4[%173, %c192_74] : memref<8x288xf32, #tpu.memory_space<vmem>>, vector<1x32xf32>
    tpu.vector_store %arg4[%173, %c192_74], %172 {strides = array<i32>} : memref<8x288xf32, #tpu.memory_space<vmem>>, vector<1x32xf32>,
    %175 = arith.index_cast %156 : i32 to index
    %c3_75 = arith.constant 3 : index
    %176 = memref.load %arg1[%175, %c3_75] : memref<8x5xi32, #tpu.memory_space<smem>>
    %177 = arith.index_cast %176 : i32 to index
    %c0_76 = arith.constant 0 : index
    %178 = vector.load %arg3[%177, %c0_76] : memref<130x32xf32, #tpu.memory_space<vmem>>, vector<1x32xf32>
    %179 = arith.index_cast %c5_i32 : i32 to index
    %c224_77 = arith.constant 224 : index
    %180 = vector.load %arg4[%179, %c224_77] : memref<8x288xf32, #tpu.memory_space<vmem>>, vector<1x32xf32>
    tpu.vector_store %arg4[%179, %c224_77], %178 {strides = array<i32>} : memref<8x288xf32, #tpu.memory_space<vmem>>, vector<1x32xf32>,
    %181 = arith.index_cast %156 : i32 to index
    %c4_78 = arith.constant 4 : index
    %182 = memref.load %arg1[%181, %c4_78] : memref<8x5xi32, #tpu.memory_space<smem>>
    %183 = arith.index_cast %182 : i32 to index
    %c0_79 = arith.constant 0 : index
    %184 = vector.load %arg3[%183, %c0_79] : memref<130x32xf32, #tpu.memory_space<vmem>>, vector<1x32xf32>
    %185 = arith.index_cast %c5_i32 : i32 to index
    %c256_80 = arith.constant 256 : index
    %186 = vector.load %arg4[%185, %c256_80] : memref<8x288xf32, #tpu.memory_space<vmem>>, vector<1x32xf32>
    tpu.vector_store %arg4[%185, %c256_80], %184 {strides = array<i32>} : memref<8x288xf32, #tpu.memory_space<vmem>>, vector<1x32xf32>,
    %c6_i32 = arith.constant 6 : i32
    %187 = arith.addi %0, %c6_i32 : i32
    %188 = arith.index_cast %187 : i32 to index
    %c0_81 = arith.constant 0 : index
    %189 = memref.load %arg1[%188, %c0_81] : memref<8x5xi32, #tpu.memory_space<smem>>
    %190 = arith.index_cast %189 : i32 to index
    %c0_82 = arith.constant 0 : index
    %191 = vector.load %arg2[%190, %c0_82] : memref<128x160xf32, #tpu.memory_space<vmem>>, vector<1x160xf32>
    %192 = arith.index_cast %c6_i32 : i32 to index
    %c0_83 = arith.constant 0 : index
    %193 = vector.load %arg4[%192, %c0_83] : memref<8x288xf32, #tpu.memory_space<vmem>>, vector<1x160xf32>
    tpu.vector_store %arg4[%192, %c0_83], %191 {strides = array<i32>} : memref<8x288xf32, #tpu.memory_space<vmem>>, vector<1x160xf32>,
    %194 = arith.index_cast %187 : i32 to index
    %c1_84 = arith.constant 1 : index
    %195 = memref.load %arg1[%194, %c1_84] : memref<8x5xi32, #tpu.memory_space<smem>>
    %196 = arith.index_cast %195 : i32 to index
    %c0_85 = arith.constant 0 : index
    %197 = vector.load %arg3[%196, %c0_85] : memref<130x32xf32, #tpu.memory_space<vmem>>, vector<1x32xf32>
    %198 = arith.index_cast %c6_i32 : i32 to index
    %c160_86 = arith.constant 160 : index
    %199 = vector.load %arg4[%198, %c160_86] : memref<8x288xf32, #tpu.memory_space<vmem>>, vector<1x32xf32>
    tpu.vector_store %arg4[%198, %c160_86], %197 {strides = array<i32>} : memref<8x288xf32, #tpu.memory_space<vmem>>, vector<1x32xf32>,
    %200 = arith.index_cast %187 : i32 to index
    %c2_87 = arith.constant 2 : index
    %201 = memref.load %arg1[%200, %c2_87] : memref<8x5xi32, #tpu.memory_space<smem>>
    %202 = arith.index_cast %201 : i32 to index
    %c0_88 = arith.constant 0 : index
    %203 = vector.load %arg3[%202, %c0_88] : memref<130x32xf32, #tpu.memory_space<vmem>>, vector<1x32xf32>
    %204 = arith.index_cast %c6_i32 : i32 to index
    %c192_89 = arith.constant 192 : index
    %205 = vector.load %arg4[%204, %c192_89] : memref<8x288xf32, #tpu.memory_space<vmem>>, vector<1x32xf32>
    tpu.vector_store %arg4[%204, %c192_89], %203 {strides = array<i32>} : memref<8x288xf32, #tpu.memory_space<vmem>>, vector<1x32xf32>,
    %206 = arith.index_cast %187 : i32 to index
    %c3_90 = arith.constant 3 : index
    %207 = memref.load %arg1[%206, %c3_90] : memref<8x5xi32, #tpu.memory_space<smem>>
    %208 = arith.index_cast %207 : i32 to index
    %c0_91 = arith.constant 0 : index
    %209 = vector.load %arg3[%208, %c0_91] : memref<130x32xf32, #tpu.memory_space<vmem>>, vector<1x32xf32>
    %210 = arith.index_cast %c6_i32 : i32 to index
    %c224_92 = arith.constant 224 : index
    %211 = vector.load %arg4[%210, %c224_92] : memref<8x288xf32, #tpu.memory_space<vmem>>, vector<1x32xf32>
    tpu.vector_store %arg4[%210, %c224_92], %209 {strides = array<i32>} : memref<8x288xf32, #tpu.memory_space<vmem>>, vector<1x32xf32>,
    %212 = arith.index_cast %187 : i32 to index
    %c4_93 = arith.constant 4 : index
    %213 = memref.load %arg1[%212, %c4_93] : memref<8x5xi32, #tpu.memory_space<smem>>
    %214 = arith.index_cast %213 : i32 to index
    %c0_94 = arith.constant 0 : index
    %215 = vector.load %arg3[%214, %c0_94] : memref<130x32xf32, #tpu.memory_space<vmem>>, vector<1x32xf32>
    %216 = arith.index_cast %c6_i32 : i32 to index
    %c256_95 = arith.constant 256 : index
    %217 = vector.load %arg4[%216, %c256_95] : memref<8x288xf32, #tpu.memory_space<vmem>>, vector<1x32xf32>
    tpu.vector_store %arg4[%216, %c256_95], %215 {strides = array<i32>} : memref<8x288xf32, #tpu.memory_space<vmem>>, vector<1x32xf32>,
    %c7_i32 = arith.constant 7 : i32
    %218 = arith.addi %0, %c7_i32 : i32
    %219 = arith.index_cast %218 : i32 to index
    %c0_96 = arith.constant 0 : index
    %220 = memref.load %arg1[%219, %c0_96] : memref<8x5xi32, #tpu.memory_space<smem>>
    %221 = arith.index_cast %220 : i32 to index
    %c0_97 = arith.constant 0 : index
    %222 = vector.load %arg2[%221, %c0_97] : memref<128x160xf32, #tpu.memory_space<vmem>>, vector<1x160xf32>
    %223 = arith.index_cast %c7_i32 : i32 to index
    %c0_98 = arith.constant 0 : index
    %224 = vector.load %arg4[%223, %c0_98] : memref<8x288xf32, #tpu.memory_space<vmem>>, vector<1x160xf32>
    tpu.vector_store %arg4[%223, %c0_98], %222 {strides = array<i32>} : memref<8x288xf32, #tpu.memory_space<vmem>>, vector<1x160xf32>,
    %225 = arith.index_cast %218 : i32 to index
    %c1_99 = arith.constant 1 : index
    %226 = memref.load %arg1[%225, %c1_99] : memref<8x5xi32, #tpu.memory_space<smem>>
    %227 = arith.index_cast %226 : i32 to index
    %c0_100 = arith.constant 0 : index
    %228 = vector.load %arg3[%227, %c0_100] : memref<130x32xf32, #tpu.memory_space<vmem>>, vector<1x32xf32>
    %229 = arith.index_cast %c7_i32 : i32 to index
    %c160_101 = arith.constant 160 : index
    %230 = vector.load %arg4[%229, %c160_101] : memref<8x288xf32, #tpu.memory_space<vmem>>, vector<1x32xf32>
    tpu.vector_store %arg4[%229, %c160_101], %228 {strides = array<i32>} : memref<8x288xf32, #tpu.memory_space<vmem>>, vector<1x32xf32>,
    %231 = arith.index_cast %218 : i32 to index
    %c2_102 = arith.constant 2 : index
    %232 = memref.load %arg1[%231, %c2_102] : memref<8x5xi32, #tpu.memory_space<smem>>
    %233 = arith.index_cast %232 : i32 to index
    %c0_103 = arith.constant 0 : index
    %234 = vector.load %arg3[%233, %c0_103] : memref<130x32xf32, #tpu.memory_space<vmem>>, vector<1x32xf32>
    %235 = arith.index_cast %c7_i32 : i32 to index
    %c192_104 = arith.constant 192 : index
    %236 = vector.load %arg4[%235, %c192_104] : memref<8x288xf32, #tpu.memory_space<vmem>>, vector<1x32xf32>
    tpu.vector_store %arg4[%235, %c192_104], %234 {strides = array<i32>} : memref<8x288xf32, #tpu.memory_space<vmem>>, vector<1x32xf32>,
    %237 = arith.index_cast %218 : i32 to index
    %c3_105 = arith.constant 3 : index
    %238 = memref.load %arg1[%237, %c3_105] : memref<8x5xi32, #tpu.memory_space<smem>>
    %239 = arith.index_cast %238 : i32 to index
    %c0_106 = arith.constant 0 : index
    %240 = vector.load %arg3[%239, %c0_106] : memref<130x32xf32, #tpu.memory_space<vmem>>, vector<1x32xf32>
    %241 = arith.index_cast %c7_i32 : i32 to index
    %c224_107 = arith.constant 224 : index
    %242 = vector.load %arg4[%241, %c224_107] : memref<8x288xf32, #tpu.memory_space<vmem>>, vector<1x32xf32>
    tpu.vector_store %arg4[%241, %c224_107], %240 {strides = array<i32>} : memref<8x288xf32, #tpu.memory_space<vmem>>, vector<1x32xf32>,
    %243 = arith.index_cast %218 : i32 to index
    %c4_108 = arith.constant 4 : index
    %244 = memref.load %arg1[%243, %c4_108] : memref<8x5xi32, #tpu.memory_space<smem>>
    %245 = arith.index_cast %244 : i32 to index
    %c0_109 = arith.constant 0 : index
    %246 = vector.load %arg3[%245, %c0_109] : memref<130x32xf32, #tpu.memory_space<vmem>>, vector<1x32xf32>
    %247 = arith.index_cast %c7_i32 : i32 to index
    %c256_110 = arith.constant 256 : index
    %248 = vector.load %arg4[%247, %c256_110] : memref<8x288xf32, #tpu.memory_space<vmem>>, vector<1x32xf32>
    tpu.vector_store %arg4[%247, %c256_110], %246 {strides = array<i32>} : memref<8x288xf32, #tpu.memory_space<vmem>>, vector<1x32xf32>,
    %c8_i32_111 = arith.constant 8 : i32
    return
  }
  func.func @transform_0(%arg0: i32, %arg1: memref<8x5xi32, #tpu.memory_space<smem>>) -> (i32, i32) {
    %c0_i32 = arith.constant 0 : i32
    %c0_i32_0 = arith.constant 0 : i32
    %c0_i32_1 = arith.constant 0 : i32
    return %c0_i32, %c0_i32_0 : i32, i32
  }
  func.func @transform_1(%arg0: i32, %arg1: memref<8x5xi32, #tpu.memory_space<smem>>) -> (i32, i32) {
    %c0_i32 = arith.constant 0 : i32
    %c0_i32_0 = arith.constant 0 : i32
    %c0_i32_1 = arith.constant 0 : i32
    return %c0_i32, %c0_i32_0 : i32, i32
  }
  func.func @transform_2(%arg0: i32, %arg1: memref<8x5xi32, #tpu.memory_space<smem>>) -> (i32, i32) {
    %c0_i32 = arith.constant 0 : i32
    %c0_i32_0 = arith.constant 0 : i32
    return %arg0, %c0_i32 : i32, i32
  }
}

</mosaic_0001>

<bundles_post_ra>
// kernel: user_rep_forward.1
= control target key start
LH: loop header
LB: loop body
LE: loop exit
PB: predicated region body
PF: predicated region fallthrough
CT: control target
= control target key end

     0   :  { %s969_s0 = inlined_call_operand.vmem [shape: s32[8,5], index: 0, kind: input, shape index: {}]   ;;  %s970_s1 = inlined_call_operand.vmem [shape: f32[128,160], index: 1, kind: input, shape index: {}]   ;;  %s971_s2 = inlined_call_operand.vmem [shape: f32[130,32], index: 2, kind: input, shape index: {}]   ;;  %s972_s3 = inlined_call_operand.hbm [shape: f32[8,288], index: 3, kind: output, shape index: {}]  }
   0x1   :  { %979 = sst [smem:[#allocation11_spill]] %s972_s3  ;;  %s8_s14 = sshll.u32 %s969_s0, 4  ;;  %s9_s14 = int_to_ptr.vmem [resolvable:$true] %s8_s14 }
   0x2   :  { %s540_s15 = scalar_lea.vmem %s9_s14, 128  ;;  %p545_p1 = scmp.lt.s32.totalorder %s9_s14, %s9_s14 }
   0x3   :  { %p541_p0 = scmp.ne.s32.totalorder %s9_s14, %s540_s15  ;;  %p546_p2 = scmp.lt.s32.totalorder %s540_s15, %s540_s15 }
   0x5   :  { %p547_p3 = por %p546_p2, %p545_p1 }
   0x7   :  { %p548_p4 = pnand %p547_p3, %p541_p0 }
   0x9   :  { %551 = shalt.err (!%p548_p4)  }
   0xa   :  { %s578_s16 = smov [#allocation3]  }
   0xb   :  { %11 = dma.vmem_to_smem %s9_s14, 128, %s578_s16, [#allocation2] }
   0xc   :  { %574 = dma.done.wait [#allocation2], 128 }
   0xd   :  { %575 = vsyncadd [#allocation2], 4294967168 }
   0xe   :  { %13 = sfence }
   0xf   :  { %s488_s17 = sld [smem:[#allocation3 + $0x101]] }
  0x10   :  { %14 = vsyncpa [#allocation5], 0  ;;  %s474_s18 = sld [smem:[#allocation3 + $0x1]]  ;;  %s612_s24 = sld [smem:[#allocation3 + $0x82]]  ;;  %v31_v12 = vlaneseq  ;;  %vm71_vm1 = vcmask 253952   ;;  %vm45_vm2 = vcmask 516352  }
  0x11   :  { %s495_s19 = sld [smem:[#allocation3 + $0x181]]  ;;  %s614_s25 = sld [smem:[#allocation3 + $0x2]]  ;;  %vm55_vm3 = vcmask 778752   ;;  %vm65_vm4 = vcmask 1041152  }
  0x12   :  { %s481_s20 = sld [smem:[#allocation3 + $0x81]]  ;;  %s619_s29 = sld [smem:[#allocation3 + $0x182]]  ;;  %vm783_vm0 = vcmp.lt.s32.totalorder %v31_v12, 160 }
  0x13   :  { %s509_s21 = sld [smem:[#allocation3 + $0x281]]  ;;  %s579_s9 = smov 32  }
  0x14   :  { %s606_s0 = sld [smem:[#allocation3 + $0x201]]  ;;  %s658_s10 = sld [smem:[#allocation3 + $0x282]] }
  0x15   :  { %s608_s22 = sld [smem:[#allocation3 + $0x381]]  ;;  %s137_s28 = scalar_lea.vmem %s971_s2, %s488_s17 }
  0x16   :  { %s610_s23 = sld [smem:[#allocation3 + $0x301]]  ;;  %v138_v0 = vld [vmem:[%s137_s28] sm:$0x1]  ;;  %s39_s5 = scalar_lea.vmem %s971_s2, %s474_s18 }
  0x17   :  { %s184_s8 = scalar_lea.vmem %s971_s2, %s495_s19  ;;  %140 = vrot.lane.b32.xlu1 %v138_v0, %s579_s9  ;;  %v40_v1 = vld [vmem:[%s39_s5] sm:$0x1]  ;;  %s643_s28 = sld [smem:[#allocation3 + $0x102]] }
  0x18   :  { %s90_s12 = scalar_lea.vmem %s971_s2, %s481_s20  ;;  %42 = vrot.lane.b32.xlu0 %v40_v1, %s579_s9  ;;  %v185_v2 = vld [vmem:[%s184_s8] sm:$0x1]  ;;  %s99_s7 = scalar_lea.vmem %s971_s2, %s612_s24 }
  0x19   :  { %s278_s15 = scalar_lea.vmem %s971_s2, %s509_s21  ;;  %v91_v3 = vld [vmem:[%s90_s12] sm:$0x1]  ;;  %s669_s13 = sld [smem:[#allocation3 + $0x302]] }
  0x1a   :  { %s231_s18 = scalar_lea.vmem %s971_s2, %s606_s0  ;;  %s49_s0 = scalar_lea.vmem %s971_s2, %s614_s25  ;;  %v279_v4 = vld [vmem:[%s278_s15] sm:$0x1] }
  0x1b   :  { %s372_s27 = scalar_lea.vmem %s971_s2, %s608_s22  ;;  %187 = vrot.lane.b32.xlu1 %v185_v2, %s579_s9  ;;  %s661_s22 = sld [smem:[#allocation3 + $0x202]]  ;;  %v232_v5 = vld [vmem:[%s231_s18] sm:$0x1] }
  0x1c   :  { %s325_s4 = scalar_lea.vmem %s971_s2, %s610_s23  ;;  %93 = vrot.lane.b32.xlu0 %v91_v3, %s579_s9  ;;  %s663_s23 = sld [smem:[#allocation3 + $0x382]]  ;;  %v373_v6 = vld [vmem:[%s372_s27] sm:$0x1] }
  0x1d   :  { %s671_s14 = sld [smem:[#allocation3 + $0x83]]  ;;  %v326_v7 = vld [vmem:[%s325_s4] sm:$0x1]  ;;  %s146_s20 = scalar_lea.vmem %s971_s2, %s643_s28 }
  0x1e   :  { %s673_s16 = sld [smem:[#allocation3 + $0x3]]  ;;  %v100_v8 = vld [vmem:[%s99_s7] sm:$0x1]  ;;  %s975_s8 = smov 64  }
  0x1f   :  { %281 = vrot.lane.b32.xlu1 %v279_v4, %s579_s9  ;;  %s676_s15 = sld [smem:[#allocation3 + $0x183]]  ;;  %v50_v9 = vld [vmem:[%s49_s0] sm:$0x1]  ;;  %s485_s24 = sld [smem:[#allocation3 + $0x100]] }
  0x20   :  { %234 = vrot.lane.b32.xlu0 %v232_v5, %s579_s9  ;;  %s679_s17 = sld [smem:[#allocation3 + $0x103]]  ;;  %s982_s3 = scalar_lea.vmem %s971_s2, %s619_s29  ;;  %v147_v11 = vld [vmem:[%s146_s20] sm:$0x1] }
  0x21   :  { %s681_s18 = sld [smem:[#allocation3 + $0x283]]  ;;  %v194_v10 = vld [vmem:[%s982_s3] sm:$0x1]  ;;  %s747_s6 = sld [smem:[#allocation3]] }
  0x22   :  { %s687_s30 = sld [smem:[#allocation3 + $0x203]]  ;;  %s753_s21 = sld [smem:[#allocation3 + $0x180]] }
  0x23   :  { %375 = vrot.lane.b32.xlu1 %v373_v6, %s579_s9  ;;  %s702_s19 = sld [smem:[#allocation3 + $0x383]]  ;;  %s755_s12 = sld [smem:[#allocation3 + $0x80]] }
  0x24   :  { %328 = vrot.lane.b32.xlu0 %v326_v7, %s579_s9  ;;  %s722_s9 = sld [smem:[#allocation3 + $0x303]]  ;;  %s757_s11 = sld [smem:[#allocation3 + $0x280]] }
  0x25   :  { %s764_s20 = sld [smem:[#allocation3 + $0x200]]  ;;  %s983_s5 = scalar_lea.vmem %s971_s2, %s658_s10 }
  0x26   :  { %v288_v13 = vld [vmem:[%s983_s5] sm:$0x1]  ;;  %s772_s25 = sld [smem:[#allocation3 + $0x380]]  ;;  %s985_s4 = scalar_lea.vmem %s971_s2, %s661_s22 }
  0x27   :  { %102 = vrot.lane.b32.xlu1 %v100_v8, %s975_s8  ;;  %s774_s0 = sld [smem:[#allocation3 + $0x300]]  ;;  %v241_v14 = vld [vmem:[%s985_s4] sm:$0x1]  ;;  %s123_s3 = sshra.s32 %s485_s24, 3 }
  0x28   :  { %52 = vrot.lane.b32.xlu0 %v50_v9, %s975_s8  ;;  %s126_s27 = sand.u32 7, %s485_s24  ;;  %s25_s28 = sand.u32 7, %s747_s6 }
  0x29   :  { %980 = sst [smem:[#allocation8_spill]] %s702_s19  ;;  %s986_s19 = smov 64  }
  0x2a   :  { %981 = sst [smem:[#allocation9_spill]] %s722_s9  ;;  %s529_s9 = sshll.u32 %s123_s3, 4 }
  0x2b   :  { %196 = vrot.lane.b32.xlu1 %v194_v10, %s975_s8  ;;  %s129_s10 = sadd.s32 %s529_s9, %s126_s27  ;;  %s989_s7 = scalar_lea.vmem %s971_s2, %s663_s23 }
  0x2c   :  { %149 = vrot.lane.b32.xlu0 %v147_v11, %s975_s8  ;;  %s22_s8 = sshra.s32 %s747_s6, 3  ;;  %v382_v16 = vld [vmem:[%s989_s7] sm:$0x1]  ;;  %s130_s5 = scalar_lea.vmem %s970_s1, %s129_s10 }
  0x2d   :  { %984 = sst [smem:[#allocation10_spill]] %s774_s0  ;;  %s527_s29 = sshll.u32 %s22_s8, 4  ;;  %v131_v18 = vld [vmem:[%s130_s5] ss:$8 sm:$0x3] }
  0x2e   :  { %s990_s4 = scalar_lea.vmem %s971_s2, %s669_s13  ;;  %s28_s6 = sadd.s32 %s527_s29, %s25_s28  ;;  %133 = vst.msk [vmem:[#allocation4 + $0x2] ss:$8 sm:$0x3] %vm783_vm0, %v131_v18 }
  0x2f   :  { %290 = vrot.lane.b32.xlu1 %v288_v13, %s986_s19  ;;  %v335_v17 = vld [vmem:[%s990_s4] sm:$0x1]  ;;  %s170_s0 = sshra.s32 %s753_s21, 3  ;;  %s29_s22 = scalar_lea.vmem %s970_s1, %s28_s6 }
  0x30   :  { %243 = vrot.lane.b32.xlu0 %v241_v14, %s986_s19  ;;  %s173_s10 = sand.u32 7, %s753_s21  ;;  %v30_v19 = vld [vmem:[%s29_s22] ss:$8 sm:$0x3]  ;;  %s530_s13 = sshll.u32 %s170_s0, 4 }
  0x31   :  { %s76_s8 = sshra.s32 %s755_s12, 3  ;;  %s991_s24 = scalar_lea.vmem %s971_s2, %s671_s14  ;;  %35 = vst.msk [vmem:[#allocation4] ss:$8 sm:$0x3] %vm783_vm0, %v30_v19 }
  0x32   :  { %v109_v20 = vld [vmem:[%s991_s24] sm:$0x1]  ;;  %s176_s3 = sadd.s32 %s530_s13, %s173_s10  ;;  %s79_s5 = sand.u32 7, %s755_s12 }
  0x33   :  { %384 = vrot.lane.b32.xlu1 %v382_v16, %s986_s19  ;;  %s992_s27 = scalar_lea.vmem %s971_s2, %s673_s16  ;;  %s528_s4 = sshll.u32 %s76_s8, 4 }
  0x34   :  { %337 = vrot.lane.b32.xlu0 %v335_v17, %s986_s19  ;;  %v60_v21 = vld [vmem:[%s992_s27] sm:$0x1]  ;;  %s177_s19 = scalar_lea.vmem %s970_s1, %s176_s3  ;;  %s82_s14 = sadd.s32 %s528_s4, %s79_s5 }
  0x35   :  { %v178_v22 = vld [vmem:[%s177_s19] ss:$8 sm:$0x3]  ;;  %s264_s6 = sshra.s32 %s757_s11, 3  ;;  %s581_s23 = smov 96  }
  0x36   :  { %s993_s22 = scalar_lea.vmem %s971_s2, %s676_s15  ;;  %180 = vst.msk [vmem:[#allocation4 + $0x3] ss:$8 sm:$0x3] %vm783_vm0, %v178_v22  ;;  %s83_s13 = scalar_lea.vmem %s970_s1, %s82_s14 }
  0x37   :  { %111 = vrot.lane.b32.xlu1 %v109_v20, %s581_s23  ;;  %v203_v23 = vld [vmem:[%s993_s22] sm:$0x1]  ;;  %s267_s8 = sand.u32 7, %s757_s11  ;;  %s532_s7 = sshll.u32 %s264_s6, 4 }
  0x38   :  { %62 = vrot.lane.b32.xlu0 %v60_v21, %s581_s23  ;;  %v84_v24 = vld [vmem:[%s83_s13] ss:$8 sm:$0x3]  ;;  %s217_s28 = sshra.s32 %s764_s20, 3  ;;  %s994_s15 = scalar_lea.vmem %s971_s2, %s679_s17 }
  0x39   :  { %v156_v25 = vld [vmem:[%s994_s15] sm:$0x1]  ;;  %86 = vst.msk [vmem:[#allocation4 + $0x1] ss:$8 sm:$0x3] %vm783_vm0, %v84_v24  ;;  %s270_s5 = sadd.s32 %s532_s7, %s267_s8  ;;  %s995_s21 = sld [smem:[#allocation10_spill]] }
  0x3a   :  { %s220_s29 = sand.u32 7, %s764_s20  ;;  %s271_s0 = scalar_lea.vmem %s970_s1, %s270_s5 }
  0x3b   :  { %s531_s9 = sshll.u32 %s217_s28, 4  ;;  %205 = vrot.lane.b32.xlu1 %v203_v23, %s581_s23  ;;  %v272_v26 = vld [vmem:[%s271_s0] ss:$8 sm:$0x3]  ;;  %s996_s19 = sld [smem:[#allocation8_spill]] }
  0x3c   :  { %s223_s4 = sadd.s32 %s531_s9, %s220_s29  ;;  %s358_s17 = sshra.s32 %s772_s25, 3  ;;  %158 = vrot.lane.b32.xlu0 %v156_v25, %s581_s23  ;;  %274 = vst.msk [vmem:[#allocation4 + $0x5] ss:$8 sm:$0x3] %vm783_vm0, %v272_v26 }
  0x3d   :  { %s997_s12 = scalar_lea.vmem %s971_s2, %s681_s18  ;;  %s998_s22 = scalar_lea.vmem %s971_s2, %s687_s30 }
  0x3e   :  { %v297_v27 = vld [vmem:[%s997_s12] sm:$0x1]  ;;  %s224_s13 = scalar_lea.vmem %s970_s1, %s223_s4  ;;  %s999_s8 = sld [smem:[#allocation9_spill]] }
  0x3f   :  { %v250_v28 = vld [vmem:[%s998_s22] sm:$0x1]  ;;  %s361_s7 = sand.u32 7, %s772_s25  ;;  %s534_s28 = sshll.u32 %s358_s17, 4  ;;  %299 = vrot.lane.b32.xlu1 %v297_v27, %s581_s23 }
  0x40   :  { %v225_v29 = vld [vmem:[%s224_s13] ss:$8 sm:$0x3]  ;;  %s311_s24 = sshra.s32 %s995_s21, 3  ;;  %s364_s18 = sadd.s32 %s534_s28, %s361_s7  ;;  %252 = vrot.lane.b32.xlu0 %v250_v28, %s581_s23 }
  0x41   :  { %227 = vst.msk [vmem:[#allocation4 + $0x4] ss:$8 sm:$0x3] %vm783_vm0, %v225_v29  ;;  %s314_s3 = sand.u32 7, %s995_s21  ;;  %s1000_s5 = scalar_lea.vmem %s971_s2, %s996_s19 }
  0x42   :  { %v391_v30 = vld [vmem:[%s1000_s5] sm:$0x1]  ;;  %s365_s27 = scalar_lea.vmem %s970_s1, %s364_s18  ;;  %s533_s25 = sshll.u32 %s311_s24, 4 }
  0x43   :  { %v366_v31 = vld [vmem:[%s365_s27] ss:$8 sm:$0x3]  ;;  %s317_s0 = sadd.s32 %s533_s25, %s314_s3  ;;  %s477_s9 = sld [smem:[#allocation3 + $0x4]]  ;;  %393 = vrot.lane.b32.xlu1 %v391_v30, %s581_s23 }
  0x44   :  { %s1001_s21 = scalar_lea.vmem %s971_s2, %s999_s8  ;;  %368 = vst.msk [vmem:[#allocation4 + $0x7] ss:$8 sm:$0x3] %vm783_vm0, %v366_v31  ;;  %s318_s6 = scalar_lea.vmem %s970_s1, %s317_s0 }
  0x45   :  { %v344_v32 = vld [vmem:[%s1001_s21] sm:$0x1]  ;;  %s484_s12 = sld [smem:[#allocation3 + $0x84]] }
  0x46   :  { %v319_v33 = vld [vmem:[%s318_s6] ss:$8 sm:$0x3]  ;;  %s491_s20 = sld [smem:[#allocation3 + $0x104]]  ;;  %346 = vrot.lane.b32.xlu0 %v344_v32, %s581_s23 }
  0x47   :  { %321 = vst.msk [vmem:[#allocation4 + $0x6] ss:$8 sm:$0x3] %vm783_vm0, %v319_v33  ;;  %s498_s26 = sld [smem:[#allocation3 + $0x184]] }
  0x48   :  { %s505_s22 = sld [smem:[#allocation3 + $0x204]] }
  0x49   :  { %s512_s16 = sld [smem:[#allocation3 + $0x284]]  ;;  %s69_s1 = scalar_lea.vmem %s971_s2, %s477_s9 }
  0x4a   :  { %s519_s10 = sld [smem:[#allocation3 + $0x304]]  ;;  %v70_v34 = vld [vmem:[%s69_s1] sm:$0x1] }
  0x4b   :  { %s526_s13 = sld [smem:[#allocation3 + $0x384]]  ;;  %s117_s18 = scalar_lea.vmem %s971_s2, %s484_s12  ;;  %72 = vst.msk [vmem:[#allocation4 + $0x10] sm:$0x1] %vm71_vm1, %v70_v34 }
  0x4c   :  { %v118_v35 = vld [vmem:[%s117_s18] sm:$0x1]  ;;  %s164_s23 = scalar_lea.vmem %s971_s2, %s491_s20 }
  0x4d   :  { %119 = vst.msk [vmem:[#allocation4 + $0x11] sm:$0x1] %vm71_vm1, %v118_v35  ;;  %v165_v36 = vld [vmem:[%s164_s23] sm:$0x1]  ;;  %s211_s29 = scalar_lea.vmem %s971_s2, %s498_s26 }
  0x4e   :  { %s258_s25 = scalar_lea.vmem %s971_s2, %s505_s22  ;;  %166 = vst.msk [vmem:[#allocation4 + $0x12] sm:$0x1] %vm71_vm1, %v165_v36  ;;  %v212_v37 = vld [vmem:[%s211_s29] sm:$0x1] }
  0x4f   :  { %v259_v38 = vld [vmem:[%s258_s25] sm:$0x1]  ;;  %s305_s4 = scalar_lea.vmem %s971_s2, %s512_s16  ;;  %213 = vst.msk [vmem:[#allocation4 + $0x13] sm:$0x1] %vm71_vm1, %v212_v37 }
  0x50   :  { %s352_s19 = scalar_lea.vmem %s971_s2, %s519_s10  ;;  %260 = vst.msk [vmem:[#allocation4 + $0x14] sm:$0x1] %vm71_vm1, %v259_v38  ;;  %v306_v39 = vld [vmem:[%s305_s4] sm:$0x1] }
  0x51   :  { %v353_v40 = vld [vmem:[%s352_s19] sm:$0x1]  ;;  %s399_s12 = scalar_lea.vmem %s971_s2, %s526_s13  ;;  %307 = vst.msk [vmem:[#allocation4 + $0x15] sm:$0x1] %vm71_vm1, %v306_v39  ;;  %s582_s2 = smov [#allocation4]  }
  0x52   :  { %354 = vst.msk [vmem:[#allocation4 + $0x16] sm:$0x1] %vm71_vm1, %v353_v40  ;;  %v400_v41 = vld [vmem:[%s399_s12] sm:$0x1]  ;;  %s408_s20 = sshll.u32 %s582_s2, 4  ;;  %s409_s20 = int_to_ptr.vmem [resolvable:$true] %s408_s20 }
  0x53   :  { %401 = vst.msk [vmem:[#allocation4 + $0x17] sm:$0x1] %vm71_vm1, %v400_v41  ;;  %s552_s26 = scalar_lea.vmem %s409_s20, 384  ;;  %p557_p6 = scmp.lt.s32.totalorder %s409_s20, %s409_s20 }
  0x54   :  { %p553_p5 = scmp.ne.s32.totalorder %s409_s20, %s552_s26  ;;  %p558_p7 = scmp.lt.s32.totalorder %s552_s26, %s552_s26 }
  0x56   :  { %p559_p8 = por %p558_p7, %p557_p6 }
  0x58   :  { %p560_p9 = pnand %p559_p8, %p553_p5 }
  0x89   :  { %v141_v42 = vpop.permute.xlu1 %140 }
  0x8a   :  { %143 = vst.msk [vmem:[#allocation4 + $0xa] sm:$0x1] %vm45_vm2, %v141_v42  ;;  %v43_v43 = vpop.permute.xlu0 %42 }
  0x8b   :  { %46 = vst.msk [vmem:[#allocation4 + $0x8] sm:$0x1] %vm45_vm2, %v43_v43 }
  0x8d   :  { %v188_v44 = vpop.permute.xlu1 %187 }
  0x8e   :  { %190 = vst.msk [vmem:[#allocation4 + $0xb] sm:$0x1] %vm45_vm2, %v188_v44  ;;  %v94_v45 = vpop.permute.xlu0 %93 }
  0x8f   :  { %96 = vst.msk [vmem:[#allocation4 + $0x9] sm:$0x1] %vm45_vm2, %v94_v45 }
  0x91   :  { %v282_v46 = vpop.permute.xlu1 %281 }
  0x92   :  { %284 = vst.msk [vmem:[#allocation4 + $0xd] sm:$0x1] %vm45_vm2, %v282_v46  ;;  %v235_v47 = vpop.permute.xlu0 %234 }
  0x93   :  { %237 = vst.msk [vmem:[#allocation4 + $0xc] sm:$0x1] %vm45_vm2, %v235_v47 }
  0x95   :  { %v376_v48 = vpop.permute.xlu1 %375 }
  0x96   :  { %378 = vst.msk [vmem:[#allocation4 + $0xf] sm:$0x1] %vm45_vm2, %v376_v48  ;;  %v329_v49 = vpop.permute.xlu0 %328 }
  0x97   :  { %331 = vst.msk [vmem:[#allocation4 + $0xe] sm:$0x1] %vm45_vm2, %v329_v49 }
  0x99   :  { %v103_v50 = vpop.permute.xlu1 %102 }
  0x9a   :  { %105 = vst.msk [vmem:[#allocation4 + $0x9] sm:$0x1] %vm55_vm3, %v103_v50  ;;  %v53_v51 = vpop.permute.xlu0 %52 }
  0x9b   :  { %56 = vst.msk [vmem:[#allocation4 + $0x8] sm:$0x1] %vm55_vm3, %v53_v51 }
  0x9d   :  { %v197_v52 = vpop.permute.xlu1 %196 }
  0x9e   :  { %199 = vst.msk [vmem:[#allocation4 + $0xb] sm:$0x1] %vm55_vm3, %v197_v52  ;;  %v150_v53 = vpop.permute.xlu0 %149 }
  0x9f   :  { %152 = vst.msk [vmem:[#allocation4 + $0xa] sm:$0x1] %vm55_vm3, %v150_v53 }
  0xa1   :  { %v291_v54 = vpop.permute.xlu1 %290 }
  0xa2   :  { %293 = vst.msk [vmem:[#allocation4 + $0xd] sm:$0x1] %vm55_vm3, %v291_v54  ;;  %v244_v55 = vpop.permute.xlu0 %243 }
  0xa3   :  { %246 = vst.msk [vmem:[#allocation4 + $0xc] sm:$0x1] %vm55_vm3, %v244_v55 }
  0xa5   :  { %v385_v56 = vpop.permute.xlu1 %384 }
  0xa6   :  { %387 = vst.msk [vmem:[#allocation4 + $0xf] sm:$0x1] %vm55_vm3, %v385_v56  ;;  %v338_v57 = vpop.permute.xlu0 %337 }
  0xa7   :  { %340 = vst.msk [vmem:[#allocation4 + $0xe] sm:$0x1] %vm55_vm3, %v338_v57 }
  0xa9   :  { %v112_v58 = vpop.permute.xlu1 %111 }
  0xaa   :  { %114 = vst.msk [vmem:[#allocation4 + $0x9] sm:$0x1] %vm65_vm4, %v112_v58  ;;  %v63_v59 = vpop.permute.xlu0 %62 }
  0xab   :  { %66 = vst.msk [vmem:[#allocation4 + $0x8] sm:$0x1] %vm65_vm4, %v63_v59 }
  0xad   :  { %v206_v60 = vpop.permute.xlu1 %205 }
  0xae   :  { %208 = vst.msk [vmem:[#allocation4 + $0xb] sm:$0x1] %vm65_vm4, %v206_v60  ;;  %v159_v61 = vpop.permute.xlu0 %158 }
  0xaf   :  { %161 = vst.msk [vmem:[#allocation4 + $0xa] sm:$0x1] %vm65_vm4, %v159_v61 }
  0xb1   :  { %v300_v62 = vpop.permute.xlu1 %299 }
  0xb2   :  { %302 = vst.msk [vmem:[#allocation4 + $0xd] sm:$0x1] %vm65_vm4, %v300_v62  ;;  %v253_v63 = vpop.permute.xlu0 %252 }
  0xb3   :  { %255 = vst.msk [vmem:[#allocation4 + $0xc] sm:$0x1] %vm65_vm4, %v253_v63 }
  0xb5   :  { %v394_v0 = vpop.permute.xlu1 %393 }
  0xb6   :  { %396 = vst.msk [vmem:[#allocation4 + $0xf] sm:$0x1] %vm65_vm4, %v394_v0 }
  0xb8   :  { %v347_v1 = vpop.permute.xlu0 %346 }
  0xb9   :  { %349 = vst.msk [vmem:[#allocation4 + $0xe] sm:$0x1] %vm65_vm4, %v347_v1 }
  0xba   :  { %563 = shalt.err (!%p560_p9)
}
  0xbb   :  { %s1002_s10 = sld [smem:[#allocation11_spill]] }
  0xc1   :  { %s564_s13 = scalar_lea.hbm %s1002_s10, 384 }
  0xc2   :  { %p565_p10 = scmp.ne.s32.totalorder %s1002_s10, %s564_s13  ;;  %p568_p11 = scmp.lt.u32.totalorder %s564_s13, %s1002_s10 }
  0xc4   :  { %p570_p12 = pnand %p568_p11, %p565_p10 }
  0xc6   :  { %573 = shalt.err (!%p570_p12)
}
  0xc7   :  { %411 = dma.vmem_to_hbm [thread:$0]  %s409_s20, 384, %s1002_s10, [#allocation5]  }
  0xc8   :  { %576 = dma.done.wait [#allocation5], 384  }
  0xc9   :  { %577 = vsyncadd [#allocation5], 4294966912 }
  0xca   :  { %415 = vsyncpa [#allocation5], 1 }

</bundles_post_ra>
